<compile_context>
chip_gen: v7x
topology: tpu7x:2x2x1
jax: 0.10.0
libtpu: 0.0.40
codegen_flags: <defaults>
</compile_context>

<pallas_src>
import jax
import jax.numpy as jnp
from jax.experimental import pallas as pl
from jax.experimental.pallas import tpu as pltpu


def _make_kernel(k, W, R, L):
    """Kernel closure over the static packing parameters.

    Packed element (p, r, l) corresponds to original pixel
    (p, h = r*k + l//W, w = l % W), with L = k*W and R = H//k.
    """

    def kernel(a_ref, b_ref, m_ref, out_ref, accx_ref, accy1_ref, accy2_ref):
        i = pl.program_id(0)

        @pl.when(i == 0)
        def _init():
            accx_ref[...] = jnp.zeros_like(accx_ref)
            accy1_ref[...] = jnp.zeros_like(accy1_ref)
            accy2_ref[...] = jnp.zeros_like(accy2_ref)

        a = a_ref[...].astype(jnp.float32)
        b = b_ref[...].astype(jnp.float32)
        m = m_ref[...].astype(jnp.float32)
        d = a - b  # gradients commute with (A - B); exact for any mask.

        # ---- x-gradient: adjacent lanes, excluding packed image-row seams ----
        tx = jnp.abs((d[:, :, 1:] - d[:, :, :-1]) *
                     (m[:, :, 1:] * m[:, :, :-1]))          # (TB, R, L-1)
        if k > 1:
            lane = jax.lax.broadcasted_iota(jnp.int32, (R, L - 1), 1)
            vx = ((lane % W) != (W - 1)).astype(jnp.float32)
            tx = tx * vx
        accx_ref[...] += jnp.sum(tx, axis=0)

        # ---- y-gradient, intra packed sublane-row (lane offset of W) ----
        if k > 1:
            ty1 = jnp.abs((d[:, :, W:] - d[:, :, :-W]) *
                          (m[:, :, W:] * m[:, :, :-W]))      # (TB, R, L-W)
            accy1_ref[...] += jnp.sum(ty1, axis=0)

        # ---- y-gradient, across packed sublane rows ----
        if R > 1:
            ty2 = jnp.abs((d[:, 1:, :W] - d[:, :-1, L - W:]) *
                          (m[:, 1:, :W] * m[:, :-1, L - W:]))  # (TB, R-1, W)
            accy2_ref[...] += jnp.sum(ty2, axis=0)

        @pl.when(i == pl.num_programs(0) - 1)
        def _finish():
            out_ref[0] = jnp.sum(accx_ref[...])
            out_ref[1] = jnp.sum(accy1_ref[...]) + jnp.sum(accy2_ref[...])

    return kernel


def masked_l1_grad(varA, varB, mask):
    """MaskedL1Grad.forward. varA, varB, mask: (N, C, H, W) float arrays."""
    N, C, H, W = varA.shape
    assert varB.shape == (N, C, H, W) and mask.shape == (N, C, H, W)
    NC = N * C

    # Lane-dense packing: fold k rows into the 128-lane axis when possible.
    if W < 128 and 128 % W == 0 and H % (128 // W) == 0:
        k = 128 // W
    else:
        k = 1
    R, L = H // k, k * W

    # Pure row-major reshape: (N, C, H, W) -> (N*C, H//k, k*W). No data movement.
    a = varA.reshape(NC, R, L)
    b = varB.reshape(NC, R, L)
    m = mask.reshape(NC, R, L)

    # Size the batched block from the device VMEM (conservative for v7x).
    try:
        vmem_cap = int(pltpu.get_tpu_info().vmem_capacity_bytes)
    except Exception:
        vmem_cap = 64 * 1024 * 1024  # assume the smallest (v7x) if query fails
    vmem_limit = min(vmem_cap * 3 // 4, 96 * 1024 * 1024)
    # Budget: 3 inputs x 2 pipeline buffers + ~8 block-sized live temporaries
    # inside the body + accumulators/slack -> one input block ~= 1/16 of limit.
    plane_bytes = R * L * 4
    block_bytes_target = max((vmem_limit - (8 << 20)) // 16, 512 * 1024)
    TB = max(1, min(NC, block_bytes_target // plane_bytes))
    G = int(pl.cdiv(NC, TB))

    if G * TB != NC:  # pad with zero planes: d = 0, m = 0 -> contribute nothing
        pad = G * TB - NC
        a = jnp.pad(a, ((0, pad), (0, 0), (0, 0)))
        b = jnp.pad(b, ((0, pad), (0, 0), (0, 0)))
        m = jnp.pad(m, ((0, pad), (0, 0), (0, 0)))

    accx_shape = (R, L - 1)
    accy1_shape = (R, L - W) if k > 1 else (8, 128)   # dummy (stays 0) if k == 1
    accy2_shape = (max(R - 1, 1), W)

    sums = pl.pallas_call(
        _make_kernel(k, W, R, L),
        out_shape=jax.ShapeDtypeStruct((2,), jnp.float32),
        grid_spec=pltpu.PrefetchScalarGridSpec(
            num_scalar_prefetch=0,
            grid=(G,),
            in_specs=[
                pl.BlockSpec((TB, R, L), lambda i: (i, 0, 0)),
                pl.BlockSpec((TB, R, L), lambda i: (i, 0, 0)),
                pl.BlockSpec((TB, R, L), lambda i: (i, 0, 0)),
            ],
            out_specs=pl.BlockSpec(memory_space=pltpu.MemorySpace.SMEM),
            scratch_shapes=[
                pltpu.VMEM(accx_shape, jnp.float32),
                pltpu.VMEM(accy1_shape, jnp.float32),
                pltpu.VMEM(accy2_shape, jnp.float32),
            ],
        ),
        compiler_params=pltpu.CompilerParams(
            dimension_semantics=("arbitrary",),
            vmem_limit_bytes=int(vmem_limit),
        ),
    )(a, b, m)

    # L1Loss(reduction='mean') over each gradient tensor, then summed.
    count_x = NC * H * (W - 1)
    count_y = NC * (H - 1) * W
    loss = jnp.float32(0.0)
    if count_x > 0:
        loss = loss + sums[0] / jnp.float32(count_x)
    if count_y > 0:
        loss = loss + sums[1] / jnp.float32(count_y)
    return loss


def _reference(varA, varB, mask):
    gxa = varA[..., :, 1:] - varA[..., :, :-1]
    gxb = varB[..., :, 1:] - varB[..., :, :-1]
    mx = mask[..., :, 1:] * mask[..., :, :-1]
    gya = varA[..., 1:, :] - varA[..., :-1, :]
    gyb = varB[..., 1:, :] - varB[..., :-1, :]
    my = mask[..., 1:, :] * mask[..., :-1, :]
    return (jnp.mean(jnp.abs(gxa * mx - gxb * mx))
            + jnp.mean(jnp.abs(gya * my - gyb * my)))


if __name__ == "__main__":
    key = jax.random.PRNGKey(0)
    kA, kB, kM = jax.random.split(key, 3)

    N, C, H, W = 2, 4, 16, 16
    varA = jax.random.normal(kA, (N, C, H, W), dtype=jnp.float32)
    varB = jax.random.normal(kB, (N, C, H, W), dtype=jnp.float32)
    mask = (jax.random.uniform(kM, (N, C, H, W)) > 0.3).astype(jnp.float32)

    loss = masked_l1_grad(varA, varB, mask)
    loss = jax.block_until_ready(loss)

    ref = _reference(varA, varB, mask)
    assert jnp.allclose(loss, ref, rtol=1e-4, atol=1e-6), (loss, ref)

    print("KERNEL_OK")
</pallas_src>

<mosaic_0001>
module attributes {stable_mosaic.version = 11 : i64} {
  func.func @kernel(%arg0: i32, %arg1: memref<8x2x128xf32, #tpu.memory_space<vmem>>, %arg2: memref<8x2x128xf32, #tpu.memory_space<vmem>>, %arg3: memref<8x2x128xf32, #tpu.memory_space<vmem>>, %arg4: memref<2xf32, #tpu.memory_space<smem>>, %arg5: memref<2x127xf32, #tpu.memory_space<vmem>>, %arg6: memref<2x112xf32, #tpu.memory_space<vmem>>, %arg7: memref<1x16xf32, #tpu.memory_space<vmem>>) attributes {dimension_semantics = [#tpu.dimension_semantics<arbitrary>], iteration_bounds = array<i64: 1>, scalar_prefetch = 0 : i64, scratch_operands = 3 : i64, tpu.core_type = #tpu.core_type<tc>, window_params = [{transform_indices = @transform_0, window_bounds = array<i64: 8, 2, 128>}, {transform_indices = @transform_1, window_bounds = array<i64: 8, 2, 128>}, {transform_indices = @transform_2, window_bounds = array<i64: 8, 2, 128>}, {transform_indices = @transform_3, window_bounds = array<i64: 2>}]} {
    %c0_i32 = arith.constant 0 : i32
    %0 = arith.cmpi eq, %arg0, %c0_i32 : i32
    %1 = arith.extui %0 : i1 to i32
    %c0_i32_0 = arith.constant 0 : i32
    %2 = arith.cmpi ne, %1, %c0_i32_0 : i32
    scf.if %2 {
      %cst_29 = arith.constant 0.000000e+00 : f32
      %70 = vector.broadcast %cst_29 : f32 to vector<2x127xf32>
      %c0_30 = arith.constant 0 : index
      %c0_31 = arith.constant 0 : index
      %71 = vector.load %arg5[%c0_30, %c0_31] : memref<2x127xf32, #tpu.memory_space<vmem>>, vector<2x127xf32>
      tpu.vector_store %arg5[%c0_30, %c0_31], %70 {strides = array<i32>} : memref<2x127xf32, #tpu.memory_space<vmem>>, vector<2x127xf32>,
      %cst_32 = arith.constant 0.000000e+00 : f32
      %72 = vector.broadcast %cst_32 : f32 to vector<2x112xf32>
      %c0_33 = arith.constant 0 : index
      %c0_34 = arith.constant 0 : index
      %73 = vector.load %arg6[%c0_33, %c0_34] : memref<2x112xf32, #tpu.memory_space<vmem>>, vector<2x112xf32>
      tpu.vector_store %arg6[%c0_33, %c0_34], %72 {strides = array<i32>} : memref<2x112xf32, #tpu.memory_space<vmem>>, vector<2x112xf32>,
      %cst_35 = arith.constant 0.000000e+00 : f32
      %74 = vector.broadcast %cst_35 : f32 to vector<1x16xf32>
      %c0_36 = arith.constant 0 : index
      %c0_37 = arith.constant 0 : index
      %75 = vector.load %arg7[%c0_36, %c0_37] : memref<1x16xf32, #tpu.memory_space<vmem>>, vector<1x16xf32>
      tpu.vector_store %arg7[%c0_36, %c0_37], %74 {strides = array<i32>} : memref<1x16xf32, #tpu.memory_space<vmem>>, vector<1x16xf32>,
    } else {
    }
    %c0 = arith.constant 0 : index
    %c0_1 = arith.constant 0 : index
    %c0_2 = arith.constant 0 : index
    %3 = vector.load %arg1[%c0, %c0_1, %c0_2] : memref<8x2x128xf32, #tpu.memory_space<vmem>>, vector<8x2x128xf32>
    %c0_3 = arith.constant 0 : index
    %c0_4 = arith.constant 0 : index
    %c0_5 = arith.constant 0 : index
    %4 = vector.load %arg2[%c0_3, %c0_4, %c0_5] : memref<8x2x128xf32, #tpu.memory_space<vmem>>, vector<8x2x128xf32>
    %c0_6 = arith.constant 0 : index
    %c0_7 = arith.constant 0 : index
    %c0_8 = arith.constant 0 : index
    %5 = vector.load %arg3[%c0_6, %c0_7, %c0_8] : memref<8x2x128xf32, #tpu.memory_space<vmem>>, vector<8x2x128xf32>
    %6 = arith.subf %3, %4 : vector<8x2x128xf32>
    %7 = vector.extract_strided_slice %6 {offsets = [0, 0, 1], sizes = [8, 2, 127], strides = [1, 1, 1]} : vector<8x2x128xf32> to vector<8x2x127xf32>
    %8 = vector.extract_strided_slice %6 {offsets = [0, 0, 0], sizes = [8, 2, 127], strides = [1, 1, 1]} : vector<8x2x128xf32> to vector<8x2x127xf32>
    %9 = arith.subf %7, %8 : vector<8x2x127xf32>
    %10 = vector.extract_strided_slice %5 {offsets = [0, 0, 1], sizes = [8, 2, 127], strides = [1, 1, 1]} : vector<8x2x128xf32> to vector<8x2x127xf32>
    %11 = vector.extract_strided_slice %5 {offsets = [0, 0, 0], sizes = [8, 2, 127], strides = [1, 1, 1]} : vector<8x2x128xf32> to vector<8x2x127xf32>
    %12 = arith.mulf %10, %11 : vector<8x2x127xf32>
    %13 = arith.mulf %9, %12 : vector<8x2x127xf32>
    %14 = math.absf %13 : vector<8x2x127xf32>
    %15 = tpu.iota {dimensions = array<i32: 1>} : vector<2x127xi32>
    %c16_i32 = arith.constant 16 : i32
    %c0_i32_9 = arith.constant 0 : i32
    %16 = arith.cmpi eq, %c16_i32, %c0_i32_9 : i32
    %c1_i32 = arith.constant 1 : i32
    %17 = arith.select %16, %c1_i32, %c16_i32 : i32
    %18 = vector.broadcast %17 : i32 to vector<2x127xi32>
    %19 = arith.remsi %15, %18 : vector<2x127xi32>
    %c0_i32_10 = arith.constant 0 : i32
    %20 = vector.broadcast %c0_i32_10 : i32 to vector<2x127xi32>
    %21 = arith.cmpi ne, %19, %20 : vector<2x127xi32>
    %c0_i32_11 = arith.constant 0 : i32
    %22 = vector.broadcast %c0_i32_11 : i32 to vector<2x127xi32>
    %23 = arith.cmpi slt, %19, %22 : vector<2x127xi32>
    %c0_i32_12 = arith.constant 0 : i32
    %24 = arith.cmpi slt, %17, %c0_i32_12 : i32
    %25 = vector.broadcast %24 : i1 to vector<2x127xi1>
    %26 = vector.broadcast %25 : vector<2x127xi1> to vector<2x127xi1>
    %27 = arith.xori %23, %26 : vector<2x127xi1>
    %28 = arith.andi %27, %21 : vector<2x127xi1>
    %29 = vector.broadcast %17 : i32 to vector<2x127xi32>
    %30 = arith.addi %19, %29 : vector<2x127xi32>
    %31 = arith.select %28, %30, %19 : vector<2x127xi1>, vector<2x127xi32>
    %c15_i32 = arith.constant 15 : i32
    %32 = vector.broadcast %c15_i32 : i32 to vector<2x127xi32>
    %33 = arith.cmpi ne, %31, %32 : vector<2x127xi32>
    %34 = arith.extui %33 : vector<2x127xi1> to vector<2x127xi32>
    %35 = arith.sitofp %34 : vector<2x127xi32> to vector<2x127xf32>
    %36 = vector.shape_cast %35 : vector<2x127xf32> to vector<1x2x127xf32>
    %37 = vector.broadcast %36 : vector<1x2x127xf32> to vector<8x2x127xf32>
    %38 = arith.mulf %14, %37 : vector<8x2x127xf32>
    %c0_13 = arith.constant 0 : index
    %c0_14 = arith.constant 0 : index
    %39 = vector.load %arg5[%c0_13, %c0_14] : memref<2x127xf32, #tpu.memory_space<vmem>>, vector<2x127xf32>
    %cst = arith.constant dense<0.000000e+00> : vector<2x127xf32>
    %40 = vector.multi_reduction <add>, %38, %cst [0] : vector<8x2x127xf32> to vector<2x127xf32>
    %41 = arith.addf %39, %40 : vector<2x127xf32>
    %c0_15 = arith.constant 0 : index
    %c0_16 = arith.constant 0 : index
    %42 = vector.load %arg5[%c0_15, %c0_16] : memref<2x127xf32, #tpu.memory_space<vmem>>, vector<2x127xf32>
    tpu.vector_store %arg5[%c0_15, %c0_16], %41 {strides = array<i32>} : memref<2x127xf32, #tpu.memory_space<vmem>>, vector<2x127xf32>,
    %43 = vector.extract_strided_slice %6 {offsets = [0, 0, 16], sizes = [8, 2, 112], strides = [1, 1, 1]} : vector<8x2x128xf32> to vector<8x2x112xf32>
    %44 = vector.extract_strided_slice %6 {offsets = [0, 0, 0], sizes = [8, 2, 112], strides = [1, 1, 1]} : vector<8x2x128xf32> to vector<8x2x112xf32>
    %45 = arith.subf %43, %44 : vector<8x2x112xf32>
    %46 = vector.extract_strided_slice %5 {offsets = [0, 0, 16], sizes = [8, 2, 112], strides = [1, 1, 1]} : vector<8x2x128xf32> to vector<8x2x112xf32>
    %47 = vector.extract_strided_slice %5 {offsets = [0, 0, 0], sizes = [8, 2, 112], strides = [1, 1, 1]} : vector<8x2x128xf32> to vector<8x2x112xf32>
    %48 = arith.mulf %46, %47 : vector<8x2x112xf32>
    %49 = arith.mulf %45, %48 : vector<8x2x112xf32>
    %50 = math.absf %49 : vector<8x2x112xf32>
    %c0_17 = arith.constant 0 : index
    %c0_18 = arith.constant 0 : index
    %51 = vector.load %arg6[%c0_17, %c0_18] : memref<2x112xf32, #tpu.memory_space<vmem>>, vector<2x112xf32>
    %cst_19 = arith.constant dense<0.000000e+00> : vector<2x112xf32>
    %52 = vector.multi_reduction <add>, %50, %cst_19 [0] : vector<8x2x112xf32> to vector<2x112xf32>
    %53 = arith.addf %51, %52 : vector<2x112xf32>
    %c0_20 = arith.constant 0 : index
    %c0_21 = arith.constant 0 : index
    %54 = vector.load %arg6[%c0_20, %c0_21] : memref<2x112xf32, #tpu.memory_space<vmem>>, vector<2x112xf32>
    tpu.vector_store %arg6[%c0_20, %c0_21], %53 {strides = array<i32>} : memref<2x112xf32, #tpu.memory_space<vmem>>, vector<2x112xf32>,
    %55 = vector.extract_strided_slice %6 {offsets = [0, 1, 0], sizes = [8, 1, 16], strides = [1, 1, 1]} : vector<8x2x128xf32> to vector<8x1x16xf32>
    %56 = vector.extract_strided_slice %6 {offsets = [0, 0, 112], sizes = [8, 1, 16], strides = [1, 1, 1]} : vector<8x2x128xf32> to vector<8x1x16xf32>
    %57 = arith.subf %55, %56 : vector<8x1x16xf32>
    %58 = vector.extract_strided_slice %5 {offsets = [0, 1, 0], sizes = [8, 1, 16], strides = [1, 1, 1]} : vector<8x2x128xf32> to vector<8x1x16xf32>
    %59 = vector.extract_strided_slice %5 {offsets = [0, 0, 112], sizes = [8, 1, 16], strides = [1, 1, 1]} : vector<8x2x128xf32> to vector<8x1x16xf32>
    %60 = arith.mulf %58, %59 : vector<8x1x16xf32>
    %61 = arith.mulf %57, %60 : vector<8x1x16xf32>
    %62 = math.absf %61 : vector<8x1x16xf32>
    %c0_22 = arith.constant 0 : index
    %c0_23 = arith.constant 0 : index
    %63 = vector.load %arg7[%c0_22, %c0_23] : memref<1x16xf32, #tpu.memory_space<vmem>>, vector<1x16xf32>
    %cst_24 = arith.constant dense<0.000000e+00> : vector<1x16xf32>
    %64 = vector.multi_reduction <add>, %62, %cst_24 [0] : vector<8x1x16xf32> to vector<1x16xf32>
    %65 = arith.addf %63, %64 : vector<1x16xf32>
    %c0_25 = arith.constant 0 : index
    %c0_26 = arith.constant 0 : index
    %66 = vector.load %arg7[%c0_25, %c0_26] : memref<1x16xf32, #tpu.memory_space<vmem>>, vector<1x16xf32>
    tpu.vector_store %arg7[%c0_25, %c0_26], %65 {strides = array<i32>} : memref<1x16xf32, #tpu.memory_space<vmem>>, vector<1x16xf32>,
    %c0_i32_27 = arith.constant 0 : i32
    %67 = arith.cmpi eq, %arg0, %c0_i32_27 : i32
    %68 = arith.extui %67 : i1 to i32
    %c0_i32_28 = arith.constant 0 : i32
    %69 = arith.cmpi ne, %68, %c0_i32_28 : i32
    scf.if %69 {
      %c0_29 = arith.constant 0 : index
      %c0_30 = arith.constant 0 : index
      %70 = vector.load %arg5[%c0_29, %c0_30] : memref<2x127xf32, #tpu.memory_space<vmem>>, vector<2x127xf32>
      %71 = vector.shape_cast %70 : vector<2x127xf32> to vector<1x2x127xf32>
      %cst_31 = arith.constant dense<0.000000e+00> : vector<1xf32>
      %72 = vector.multi_reduction <add>, %71, %cst_31 [1, 2] : vector<1x2x127xf32> to vector<1xf32>
      %73 = vector.shape_cast %72 : vector<1xf32> to vector<1x1x1xf32>
      %74 = vector.extract %73[0, 0, 0] : f32 from vector<1x1x1xf32>
      %c0_32 = arith.constant 0 : index
      %75 = memref.load %arg4[%c0_32] : memref<2xf32, #tpu.memory_space<smem>>
      memref.store %74, %arg4[%c0_32] : memref<2xf32, #tpu.memory_space<smem>>
      %c0_33 = arith.constant 0 : index
      %c0_34 = arith.constant 0 : index
      %76 = vector.load %arg6[%c0_33, %c0_34] : memref<2x112xf32, #tpu.memory_space<vmem>>, vector<2x112xf32>
      %77 = vector.shape_cast %76 : vector<2x112xf32> to vector<1x2x112xf32>
      %cst_35 = arith.constant dense<0.000000e+00> : vector<1xf32>
      %78 = vector.multi_reduction <add>, %77, %cst_35 [1, 2] : vector<1x2x112xf32> to vector<1xf32>
      %79 = vector.shape_cast %78 : vector<1xf32> to vector<1x1x1xf32>
      %80 = vector.extract %79[0, 0, 0] : f32 from vector<1x1x1xf32>
      %c0_36 = arith.constant 0 : index
      %c0_37 = arith.constant 0 : index
      %81 = vector.load %arg7[%c0_36, %c0_37] : memref<1x16xf32, #tpu.memory_space<vmem>>, vector<1x16xf32>
      %82 = vector.shape_cast %81 : vector<1x16xf32> to vector<1x1x16xf32>
      %cst_38 = arith.constant dense<0.000000e+00> : vector<1xf32>
      %83 = vector.multi_reduction <add>, %82, %cst_38 [1, 2] : vector<1x1x16xf32> to vector<1xf32>
      %84 = vector.shape_cast %83 : vector<1xf32> to vector<1x1x1xf32>
      %85 = vector.extract %84[0, 0, 0] : f32 from vector<1x1x1xf32>
      %86 = arith.addf %80, %85 : f32
      %c1 = arith.constant 1 : index
      %87 = memref.load %arg4[%c1] : memref<2xf32, #tpu.memory_space<smem>>
      memref.store %86, %arg4[%c1] : memref<2xf32, #tpu.memory_space<smem>>
    } else {
    }
    return
  }
  func.func @transform_0(%arg0: i32) -> (i32, i32, i32) {
    %c0_i32 = arith.constant 0 : i32
    %c0_i32_0 = arith.constant 0 : i32
    %c0_i32_1 = arith.constant 0 : i32
    return %arg0, %c0_i32, %c0_i32_0 : i32, i32, i32
  }
  func.func @transform_1(%arg0: i32) -> (i32, i32, i32) {
    %c0_i32 = arith.constant 0 : i32
    %c0_i32_0 = arith.constant 0 : i32
    %c0_i32_1 = arith.constant 0 : i32
    return %arg0, %c0_i32, %c0_i32_0 : i32, i32, i32
  }
  func.func @transform_2(%arg0: i32) -> (i32, i32, i32) {
    %c0_i32 = arith.constant 0 : i32
    %c0_i32_0 = arith.constant 0 : i32
    %c0_i32_1 = arith.constant 0 : i32
    return %arg0, %c0_i32, %c0_i32_0 : i32, i32, i32
  }
  func.func @transform_3(%arg0: i32) -> i32 {
    %c0_i32 = arith.constant 0 : i32
    %c0_i32_0 = arith.constant 0 : i32
    return %c0_i32 : i32
  }
}

</mosaic_0001>

<bundles_post_ra>
// kernel: tpu_custom_call.1
= control target key start
LH: loop header
LB: loop body
LE: loop exit
PB: predicated region body
PF: predicated region fallthrough
CT: control target
= control target key end

     0   :  { %8 = vsyncpa [#allocation6], 0  ;;  %s969_s0 = inlined_call_operand.hbm [shape: f32[8,2,128], index: 0, kind: input, shape index: {}]   ;;  %s970_s1 = inlined_call_operand.hbm [shape: f32[8,2,128], index: 1, kind: input, shape index: {}]   ;;  %s971_s2 = inlined_call_operand.hbm [shape: f32[8,2,128], index: 2, kind: input, shape index: {}]   ;;  %s972_s3 = inlined_call_operand.hbm [shape: f32[2], index: 3, kind: output, shape index: {}]  }
   0x1   :  { %9 = vsyncpa [#allocation9], 0 }
   0x2   :  { %10 = vsyncpa [#allocation7], 0  ;;  %s641_s12 = smov [#allocation8]   ;;  %s642_s14 = smov [#allocation5]  }
   0x3   :  { %s28_s13 = sshll.u32 %s641_s12, 4  ;;  %s16_s15 = sshll.u32 %s642_s14, 4  ;;  %s29_s13 = int_to_ptr.vmem [resolvable:$true] %s28_s13  ;;  %s673_s15 = int_to_ptr.vmem [resolvable:$true] %s16_s15 }
   0x4   :  { %s559_s18 = scalar_lea.hbm %s970_s1, 256 }
   0x5   :  { %p560_p0 = scmp.ne.s32.totalorder %s970_s1, %s559_s18  ;;  %p563_p1 = scmp.lt.u32.totalorder %s559_s18, %s970_s1 }
   0x7   :  { %p565_p2 = pnand %p563_p1, %p560_p0 }
   0x9   :  { %568 = shalt.err (!%p565_p2)
}
   0xa   :  { %s569_s23 = scalar_lea.vmem %s29_s13, 256  ;;  %p574_p4 = scmp.lt.s32.totalorder %s29_s13, %s29_s13 }
   0xb   :  { %p570_p3 = scmp.ne.s32.totalorder %s29_s13, %s569_s23  ;;  %p575_p5 = scmp.lt.s32.totalorder %s569_s23, %s569_s23 }
   0xd   :  { %p576_p6 = por %p575_p5, %p574_p4 }
   0xf   :  { %p577_p7 = pnand %p576_p6, %p570_p3 }
  0x11   :  { %580 = shalt.err (!%p577_p7)
}
  0x12   :  { %s643_s24 = smov 32   ;;  %s644_s25 = smov 2  }
  0x13   :  { %34 = dma.hbm_to_vmem [thread:$0]  %s970_s1, 256, %s29_s13, [#allocation9], %s643_s24, %s643_s24, %s644_s25  }
  0x14   :  { %s581_s30 = scalar_lea.hbm %s969_s0, 256 }
  0x15   :  { %p582_p8 = scmp.ne.s32.totalorder %s969_s0, %s581_s30  ;;  %p585_p9 = scmp.lt.u32.totalorder %s581_s30, %s969_s0 }
  0x17   :  { %p587_p10 = pnand %p585_p9, %p582_p8 }
  0x19   :  { %590 = shalt.err (!%p587_p10)
}
  0x1a   :  { %s591_s8 = scalar_lea.vmem %s673_s15, 256  ;;  %p596_p12 = scmp.lt.s32.totalorder %s673_s15, %s673_s15 }
  0x1b   :  { %p592_p11 = scmp.ne.s32.totalorder %s673_s15, %s591_s8  ;;  %p597_p13 = scmp.lt.s32.totalorder %s591_s8, %s591_s8 }
  0x1d   :  { %p598_p0 = por %p597_p13, %p596_p12 }
  0x1f   :  { %p599_p1 = pnand %p598_p0, %p592_p11 }
  0x21   :  { %602 = shalt.err (!%p599_p1)
}
  0x22   :  { %22 = dma.hbm_to_vmem [thread:$0]  %s969_s0, 256, %s673_s15, [#allocation6], %s643_s24, %s643_s24, %s644_s25  }
  0x23   :  { %s645_s10 = smov [#allocation10]   ;;  %s603_s14 = scalar_lea.hbm %s971_s2, 256 }
  0x24   :  { %s40_s11 = sshll.u32 %s645_s10, 4  ;;  %p604_p2 = scmp.ne.s32.totalorder %s971_s2, %s603_s14  ;;  %s41_s11 = int_to_ptr.vmem [resolvable:$true] %s40_s11 }
  0x25   :  { %p607_p3 = scmp.lt.u32.totalorder %s603_s14, %s971_s2 }
  0x27   :  { %p609_p4 = pnand %p607_p3, %p604_p2 }
  0x29   :  { %612 = shalt.err (!%p609_p4)
}
  0x2a   :  { %s613_s20 = scalar_lea.vmem %s41_s11, 256  ;;  %p618_p6 = scmp.lt.s32.totalorder %s41_s11, %s41_s11 }
  0x2b   :  { %p614_p5 = scmp.ne.s32.totalorder %s41_s11, %s613_s20  ;;  %p619_p7 = scmp.lt.s32.totalorder %s613_s20, %s613_s20 }
  0x2d   :  { %p620_p8 = por %p619_p7, %p618_p6 }
  0x2f   :  { %p621_p9 = pnand %p620_p8, %p614_p5 }
  0x31   :  { %624 = shalt.err (!%p621_p9)
}
  0x32   :  { %46 = dma.hbm_to_vmem [thread:$0]  %s971_s2, 256, %s41_s11, [#allocation9], %s643_s24, %s643_s24, %s644_s25  }
  0x33   :  { %635 = dma.done.wait [#allocation6], 256  }
  0x34   :  { %636 = vsyncadd [#allocation6], 4294967040 }
  0x35   :  { %637 = dma.done.wait [#allocation9], 512  }
  0x36   :  { %638 = vsyncadd [#allocation9], 4294966784  ;;  %v725_v0 = vld [vmem:[#allocation10] sm:$0x3]  ;;  %v74_v2 = vld [vmem:[#allocation8] sm:$0x3]  ;;  %v194_v14 = vlaneseq }
  0x37   :  { %v66_v1 = vld [vmem:[#allocation5] sm:$0x3]  ;;  %s646_s21 = smov 1   ;;  %v67_v4 = vld [vmem:[#allocation5 + $0x2] sm:$0x3]  ;;  %s647_s2 = smov 16  }
  0x38   :  { %146 = vrot.lane.b32.xlu1 %v725_v0, %s646_s21  ;;  %v729_v3 = vsub.f32 %v66_v1, %v74_v2  ;;  %v75_v5 = vld [vmem:[#allocation8 + $0x2] sm:$0x3]  ;;  %v731_v6 = vld [vmem:[#allocation10 + $0x2] sm:$0x3]  ;;  %v68_v8 = vld [vmem:[#allocation5 + $0x4] sm:$0x3] }
  0x39   :  { %v735_v7 = vsub.f32 %v67_v4, %v75_v5  ;;  %v76_v9 = vld [vmem:[#allocation8 + $0x4] sm:$0x3]  ;;  %v739_v10 = vld [vmem:[#allocation10 + $0x4] sm:$0x3]  ;;  %v69_v12 = vld [vmem:[#allocation5 + $0x6] sm:$0x3] }
  0x3a   :  { %106 = vrot.lane.b32.xlu0 %v729_v3, %s646_s21  ;;  %v743_v11 = vsub.f32 %v68_v8, %v76_v9  ;;  %v77_v13 = vld [vmem:[#allocation8 + $0x6] sm:$0x3]  ;;  %v755_v15 = vld [vmem:[#allocation10 + $0x6] sm:$0x3]  ;;  %v195_v17 = vand.u32 127, %v194_v14  ;;  %v648_v25 = vmov 0.0  }
  0x3b   :  { %v759_v16 = vsub.f32 %v69_v12, %v77_v13  ;;  %v70_v18 = vld [vmem:[#allocation5 + $0x8] sm:$0x3]  ;;  %v78_v19 = vld [vmem:[#allocation8 + $0x8] sm:$0x3]  ;;  %v71_v23 = vld [vmem:[#allocation5 + $0xa] sm:$0x3] }
  0x3c   :  { %148 = vrot.lane.b32.xlu1 %v731_v6, %s646_s21  ;;  %v200_v20 = vand.u32 15, %v195_v17  ;;  %v768_v21 = vld [vmem:[#allocation10 + $0x8] sm:$0x3]  ;;  %v772_v22 = vsub.f32 %v70_v18, %v78_v19  ;;  %v79_v24 = vld [vmem:[#allocation8 + $0xa] sm:$0x3]  ;;  %v351_v37 = vrot.slane %v729_v3, 7 }
  0x3d   :  { %v781_v27 = vsub.f32 %v71_v23, %v79_v24  ;;  %v72_v28 = vld [vmem:[#allocation5 + $0xc] sm:$0x3]  ;;  %v80_v29 = vld [vmem:[#allocation8 + $0xc] sm:$0x3]  ;;  %v788_v30 = vld [vmem:[#allocation10 + $0xa] sm:$0x3] }
  0x3e   :  { %108 = vrot.lane.b32.xlu0 %v735_v7, %s646_s21  ;;  %vm208_vm0 = vcmp.ne.s32.totalorder %v200_v20, 15  ;;  %v792_v31 = vsub.f32 %v72_v28, %v80_v29  ;;  %v73_v32 = vld [vmem:[#allocation5 + $0xe] sm:$0x3]  ;;  %v81_v33 = vld [vmem:[#allocation8 + $0xe] sm:$0x3]  ;;  %v391_v38 = vrot.slane %v725_v0, 7 }
  0x3f   :  { %v540_v26 = vsel %vm208_vm0, 1.0, %v648_v25  ;;  %v800_v34 = vld [vmem:[#allocation10 + $0xc] sm:$0x3]  ;;  %v804_v35 = vsub.f32 %v73_v32, %v81_v33  ;;  %v812_v36 = vld [vmem:[#allocation10 + $0xe] sm:$0x3]  ;;  %v352_v39 = vrot.slane %v735_v7, 7 }
  0x40   :  { %150 = vrot.lane.b32.xlu1 %v739_v10, %s646_s21  ;;  %v353_v40 = vrot.slane %v743_v11, 7  ;;  %v392_v41 = vrot.slane %v731_v6, 7  ;;  %v354_v42 = vrot.slane %v759_v16, 7  ;;  %v393_v43 = vrot.slane %v739_v10, 7  ;;  %s649_s22 = smov 127   ;;  %s650_s23 = smov 112  }
  0x41   :  { %v355_v44 = vrot.slane %v772_v22, 7  ;;  %v394_v45 = vrot.slane %v755_v15, 7  ;;  %v356_v46 = vrot.slane %v781_v27, 7  ;;  %v395_v47 = vrot.slane %v768_v21, 7  ;;  %s625_s30 = scalar_lea.hbm %s972_s3, 16 }
  0x42   :  { %110 = vrot.lane.b32.xlu0 %v743_v11, %s646_s21  ;;  %v357_v48 = vrot.slane %v792_v31, 7  ;;  %v396_v49 = vrot.slane %v788_v30, 7  ;;  %v358_v50 = vrot.slane %v804_v35, 7  ;;  %v397_v51 = vrot.slane %v800_v34, 7  ;;  %p626_p10 = scmp.ne.s32.totalorder %s972_s3, %s625_s30  ;;  %p629_p11 = scmp.lt.u32.totalorder %s625_s30, %s972_s3 }
  0x43   :  { %v398_v52 = vrot.slane %v812_v36, 7  ;;  %vm60_vm1 = vcmask 1033216   ;;  %vm64_vm2 = vcmask 122880   ;;  %vm224_vm3 = vcmask 1041416  }
  0x44   :  { %249 = vrot.lane.b32.xlu1 %v735_v7, %s647_s2  ;;  %61 = vst.msk [vmem:[#allocation2] sm:$0x3] %vm60_vm1, %v648_v25  ;;  %vm328_vm4 = vcmask 1041536   ;;  %vm62_vm5 = vcmask 910336   ;;  %vm448_vm6 = vcmask 123905   ;;  %p631_p12 = pnand %p629_p11, %p626_p10 }
  0x45   :  { %65 = vst.msk [vmem:[#allocation4] sm:$0x1] %vm64_vm2, %v648_v25 }
  0x46   :  { %247 = vrot.lane.b32.xlu0 %v729_v3, %s647_s2  ;;  %63 = vst.msk [vmem:[#allocation3] sm:$0x3] %vm62_vm5, %v648_v25 }
  0x48   :  { %281 = vrot.lane.b32.xlu1 %v731_v6, %s647_s2 }
  0x4a   :  { %279 = vrot.lane.b32.xlu0 %v725_v0, %s647_s2 }
  0x4c   :  { %152 = vrot.lane.b32.xlu1 %v755_v15, %s646_s21 }
  0x4e   :  { %112 = vrot.lane.b32.xlu0 %v759_v16, %s646_s21 }
  0x50   :  { %283 = vrot.lane.b32.xlu1 %v739_v10, %s647_s2 }
  0x52   :  { %251 = vrot.lane.b32.xlu0 %v743_v11, %s647_s2 }
  0x54   :  { %154 = vrot.lane.b32.xlu1 %v768_v21, %s646_s21 }
  0x56   :  { %114 = vrot.lane.b32.xlu0 %v772_v22, %s646_s21 }
  0x58   :  { %253 = vrot.lane.b32.xlu1 %v759_v16, %s647_s2 }
  0x5a   :  { %212 = vrot.lane.b32.xlu0 %v540_v26, %s646_s21 }
  0x5c   :  { %116 = vrot.lane.b32.xlu1 %v781_v27, %s646_s21 }
  0x5e   :  { %285 = vrot.lane.b32.xlu0 %v755_v15, %s647_s2 }
  0x60   :  { %255 = vrot.lane.b32.xlu1 %v772_v22, %s647_s2 }
  0x62   :  { %156 = vrot.lane.b32.xlu0 %v788_v30, %s646_s21 }
  0x64   :  { %118 = vrot.lane.b32.xlu1 %v792_v31, %s646_s21 }
  0x66   :  { %287 = vrot.lane.b32.xlu0 %v768_v21, %s647_s2 }
  0x68   :  { %257 = vrot.lane.b32.xlu1 %v781_v27, %s647_s2 }
  0x6a   :  { %158 = vrot.lane.b32.xlu0 %v800_v34, %s646_s21 }
  0x6c   :  { %120 = vrot.lane.b32.xlu1 %v804_v35, %s646_s21 }
  0x6e   :  { %289 = vrot.lane.b32.xlu0 %v788_v30, %s647_s2 }
  0x70   :  { %259 = vrot.lane.b32.xlu1 %v792_v31, %s647_s2 }
  0x72   :  { %160 = vrot.lane.b32.xlu0 %v812_v36, %s646_s21 }
  0x74   :  { %261 = vrot.lane.b32.xlu1 %v804_v35, %s647_s2 }
  0x76   :  { %291 = vrot.lane.b32.xlu0 %v800_v34, %s647_s2 }
  0x78   :  { %359 = vrot.lane.b32.xlu1 %v351_v37, %s647_s2 }
  0x7a   :  { %293 = vrot.lane.b32.xlu0 %v812_v36, %s647_s2 }
  0x7c   :  { %399 = vrot.lane.b32.xlu1 %v391_v38, %s647_s2 }
  0x7e   :  { %361 = vrot.lane.b32.xlu0 %v352_v39, %s647_s2 }
  0x80   :  { %363 = vrot.lane.b32.xlu1 %v353_v40, %s647_s2 }
  0x82   :  { %401 = vrot.lane.b32.xlu0 %v392_v41, %s647_s2 }
  0x84   :  { %365 = vrot.lane.b32.xlu1 %v354_v42, %s647_s2 }
  0x86   :  { %403 = vrot.lane.b32.xlu0 %v393_v43, %s647_s2 }
  0x88   :  { %367 = vrot.lane.b32.xlu1 %v355_v44, %s647_s2 }
  0x8a   :  { %405 = vrot.lane.b32.xlu0 %v394_v45, %s647_s2 }
  0x8c   :  { %369 = vrot.lane.b32.xlu1 %v356_v46, %s647_s2 }
  0x8e   :  { %407 = vrot.lane.b32.xlu0 %v395_v47, %s647_s2 }
  0x90   :  { %371 = vrot.lane.b32.xlu1 %v357_v48, %s647_s2 }
  0x92   :  { %409 = vrot.lane.b32.xlu0 %v396_v49, %s647_s2 }
  0x94   :  { %373 = vrot.lane.b32.xlu1 %v358_v50, %s647_s2 }
  0x96   :  { %411 = vrot.lane.b32.xlu0 %v397_v51, %s647_s2 }
  0x9a   :  { %413 = vrot.lane.b32.xlu0 %v398_v52, %s647_s2 }
  0xaa   :  { %v147_v53 = vpop.permute.xlu1 %146 }
  0xab   :  { %v170_v12 = vmul.f32 %v147_v53, %v725_v0 }
  0xac   :  { %v107_v54 = vpop.permute.xlu0 %106 }
  0xad   :  { %v130_v13 = vsub.f32 %v729_v3, %v107_v54 }
  0xae   :  { %v149_v55 = vpop.permute.xlu1 %148 }
  0xaf   :  { %v171_v17 = vmul.f32 %v149_v55, %v731_v6  ;;  %v178_v23 = vmul.f32 %v170_v12, %v130_v13 }
  0xb0   :  { %v109_v56 = vpop.permute.xlu0 %108 }
  0xb1   :  { %v131_v18 = vsub.f32 %v735_v7, %v109_v56  ;;  %v186_v33 = vand.u32 2147483647, %v178_v23 }
  0xb2   :  { %v151_v57 = vpop.permute.xlu1 %150 }
  0xb3   :  { %v179_v24 = vmul.f32 %v171_v17, %v131_v18  ;;  %v172_v26 = vmul.f32 %v151_v57, %v739_v10 }
  0xb4   :  { %v111_v58 = vpop.permute.xlu0 %110 }
  0xb5   :  { %v132_v28 = vsub.f32 %v743_v11, %v111_v58  ;;  %v187_v37 = vand.u32 2147483647, %v179_v24 }
  0xb6   :  { %v250_v59 = vpop.permute.xlu1 %249 }
  0xb7   :  { %v180_v38 = vmul.f32 %v172_v26, %v132_v28  ;;  %v272_v47 = vsub.f32 %v735_v7, %v250_v59 }
  0xb8   :  { %v248_v60 = vpop.permute.xlu0 %247 }
  0xb9   :  { %v188_v50 = vand.u32 2147483647, %v180_v38  ;;  %v271_v55 = vsub.f32 %v729_v3, %v248_v60 }
  0xba   :  { %v282_v61 = vpop.permute.xlu1 %281 }
  0xbb   :  { %v304_v51 = vmul.f32 %v282_v61, %v731_v6 }
  0xbc   :  { %v280_v62 = vpop.permute.xlu0 %279 }
  0xbd   :  { %v303_v52 = vmul.f32 %v280_v62, %v725_v0  ;;  %v312_v62 = vmul.f32 %v304_v51, %v272_v47 }
  0xbe   :  { %v153_v63 = vpop.permute.xlu1 %152 }
  0xbf   :  { %v173_v39 = vmul.f32 %v153_v63, %v755_v15  ;;  %v311_v12 = vmul.f32 %v303_v52, %v271_v55 }
  0xc0   :  { %v113_v1 = vpop.permute.xlu0 %112 }
  0xc1   :  { %v133_v40 = vsub.f32 %v759_v16, %v113_v1 }
  0xc2   :  { %v284_v2 = vpop.permute.xlu1 %283 }
  0xc3   :  { %v181_v53 = vmul.f32 %v173_v39, %v133_v40  ;;  %v305_v58 = vmul.f32 %v284_v2, %v739_v10  ;;  %v320_v40 = vand.u32 2147483647, %v312_v62 }
  0xc4   :  { %v252_v4 = vpop.permute.xlu0 %251 }
  0xc5   :  { %v273_v59 = vsub.f32 %v743_v11, %v252_v4  ;;  %v189_v13 = vand.u32 2147483647, %v181_v53  ;;  %v330_v52 = vsel %vm328_vm4, %v320_v40, 0.0 }
  0xc6   :  { %v155_v5 = vpop.permute.xlu1 %154 }
  0xc7   :  { %v174_v44 = vmul.f32 %v155_v5, %v768_v21 }
  0xc8   :  { %v115_v8 = vpop.permute.xlu0 %114 }
  0xc9   :  { %v134_v45 = vsub.f32 %v772_v22, %v115_v8 }
  0xca   :  { %v858_v9 = vpop.permute.xlu1 %253 }
  0xcb   :  { %v182_v63 = vmul.f32 %v174_v44, %v134_v45  ;;  %v274_v18 = vsub.f32 %v759_v16, %v858_v9  ;;  %v319_v9 = vand.u32 2147483647, %v311_v12 }
  0xcc   :  { %v864_v19 = vpop.permute.xlu0 %212 }
  0xcd   :  { %v215_v42 = vmul.f32 %v864_v19, %v186_v33  ;;  %v216_v43 = vmul.f32 %v864_v19, %v187_v37  ;;  %v217_v5 = vmul.f32 %v864_v19, %v188_v50  ;;  %v190_v23 = vand.u32 2147483647, %v182_v63 }
  0xce   :  { %v117_v20 = vpop.permute.xlu1 %116  ;;  %v218_v26 = vmul.f32 %v864_v19, %v189_v13 }
  0xcf   :  { %v135_v48 = vsub.f32 %v781_v27, %v117_v20  ;;  %v225_v56 = vsel %vm224_vm3, %v215_v42, 0.0  ;;  %v226_v57 = vsel %vm224_vm3, %v216_v43, 0.0  ;;  %v313_v20 = vmul.f32 %v305_v58, %v273_v59 }
  0xd0   :  { %v286_v29 = vpop.permute.xlu0 %285  ;;  %v227_v60 = vadd.f32 %v226_v57, %v225_v56  ;;  %v228_v28 = vsel %vm224_vm3, %v217_v5, 0.0  ;;  %v230_v51 = vsel %vm224_vm3, %v218_v26, 0.0  ;;  %v329_v56 = vsel %vm328_vm4, %v319_v9, 0.0 }
  0xd1   :  { %v306_v2 = vmul.f32 %v286_v29, %v755_v15  ;;  %v331_v12 = vadd.f32 %v330_v52, %v329_v56 }
  0xd2   :  { %v868_v32 = vpop.permute.xlu1 %255  ;;  %v229_v42 = vadd.f32 %v228_v28, %v227_v60 }
  0xd3   :  { %v275_v37 = vsub.f32 %v772_v22, %v868_v32  ;;  %v314_v43 = vmul.f32 %v306_v2, %v274_v18 }
  0xd4   :  { %v157_v41 = vpop.permute.xlu0 %156  ;;  %v231_v55 = vadd.f32 %v230_v51, %v229_v42 }
  0xd5   :  { %v175_v49 = vmul.f32 %v157_v41, %v788_v30  ;;  %v322_v57 = vand.u32 2147483647, %v314_v43 }
  0xd6   :  { %v119_v46 = vpop.permute.xlu1 %118 }
  0xd7   :  { %v183_v8 = vmul.f32 %v175_v49, %v135_v48  ;;  %v136_v61 = vsub.f32 %v792_v31, %v119_v46  ;;  %v321_v46 = vand.u32 2147483647, %v313_v20  ;;  %v219_v48 = vmul.f32 %v864_v19, %v190_v23 }
  0xd8   :  { %v288_v54 = vpop.permute.xlu0 %287  ;;  %v334_v18 = vsel %vm328_vm4, %v322_v57, 0.0 }
  0xd9   :  { %v191_v33 = vand.u32 2147483647, %v183_v8  ;;  %v307_v38 = vmul.f32 %v288_v54, %v768_v21  ;;  %v332_v25 = vsel %vm328_vm4, %v321_v46, 0.0 }
  0xda   :  { %v258_v1 = vpop.permute.xlu1 %257  ;;  %v333_v23 = vadd.f32 %v332_v25, %v331_v12 }
  0xdb   :  { %v276_v29 = vsub.f32 %v781_v27, %v258_v1  ;;  %v220_v32 = vmul.f32 %v864_v19, %v191_v33  ;;  %v315_v49 = vmul.f32 %v307_v38, %v275_v37  ;;  %v232_v1 = vsel %vm224_vm3, %v219_v48, 0.0 }
  0xdc   :  { %v159_v17 = vpop.permute.xlu0 %158  ;;  %v233_v60 = vadd.f32 %v232_v1, %v231_v55 }
  0xdd   :  { %v176_v4 = vmul.f32 %v159_v17, %v800_v34  ;;  %v234_v5 = vsel %vm224_vm3, %v220_v32, 0.0  ;;  %v323_v8 = vand.u32 2147483647, %v315_v49 }
  0xde   :  { %v121_v24 = vpop.permute.xlu1 %120 }
  0xdf   :  { %v184_v39 = vmul.f32 %v176_v4, %v136_v61  ;;  %v137_v50 = vsub.f32 %v804_v35, %v121_v24  ;;  %v235_v24 = vadd.f32 %v234_v5, %v233_v60  ;;  %v336_v28 = vsel %vm328_vm4, %v323_v8, 0.0 }
  0xe0   :  { %v290_v41 = vpop.permute.xlu0 %289 }
  0xe1   :  { %v192_v44 = vand.u32 2147483647, %v184_v39  ;;  %v308_v45 = vmul.f32 %v290_v41, %v788_v30  ;;  %v335_v39 = vadd.f32 %v334_v18, %v333_v23 }
  0xe2   :  { %v260_v47 = vpop.permute.xlu1 %259 }
  0xe3   :  { %v316_v53 = vmul.f32 %v308_v45, %v276_v29  ;;  %v221_v58 = vmul.f32 %v864_v19, %v192_v44  ;;  %v277_v62 = vsub.f32 %v792_v31, %v260_v47  ;;  %v337_v45 = vadd.f32 %v336_v28, %v335_v39 }
  0xe4   :  { %v161_v54 = vpop.permute.xlu0 %160 }
  0xe5   :  { %v177_v59 = vmul.f32 %v161_v54, %v812_v36  ;;  %v324_v13 = vand.u32 2147483647, %v316_v53  ;;  %v236_v20 = vsel %vm224_vm3, %v221_v58, 0.0 }
  0xe6   :  { %v262_v63 = vpop.permute.xlu1 %261  ;;  %v237_v29 = vadd.f32 %v236_v20, %v235_v24 }
  0xe7   :  { %v185_v61 = vmul.f32 %v177_v59, %v137_v50  ;;  %v278_v38 = vsub.f32 %v804_v35, %v262_v63  ;;  %v338_v40 = vsel %vm328_vm4, %v324_v13, 0.0 }
  0xe8   :  { %v292_v17 = vpop.permute.xlu0 %291  ;;  %v339_v49 = vadd.f32 %v338_v40, %v337_v45  ;;  %v651_v45 = vmov 1966171168  }
  0xe9   :  { %v193_v2 = vand.u32 2147483647, %v185_v61  ;;  %v309_v4 = vmul.f32 %v292_v17, %v800_v34 }
  0xea   :  { %v360_v26 = vpop.permute.xlu1 %359 }
  0xeb   :  { %v222_v33 = vmul.f32 %v864_v19, %v193_v2  ;;  %v317_v37 = vmul.f32 %v309_v4, %v277_v62  ;;  %v383_v44 = vsub.f32 %v729_v3, %v360_v26 }
  0xec   :  { %v294_v9 = vpop.permute.xlu0 %293 }
  0xed   :  { %v325_v41 = vand.u32 2147483647, %v317_v37  ;;  %v310_v42 = vmul.f32 %v294_v9, %v812_v36  ;;  %v238_v43 = vsel %vm224_vm3, %v222_v33, 0.0 }
  0xee   :  { %v239_v46 = vadd.f32 %v238_v43, %v237_v29  ;;  %v400_v47 = vpop.permute.xlu1 %399 }
  0xef   :  { %v340_v19 = vsel %vm328_vm4, %v325_v41, 0.0  ;;  %v318_v48 = vmul.f32 %v310_v42, %v278_v38  ;;  %v423_v32 = vmul.f32 %v400_v47, %v725_v0 }
  0xf0   :  { %241 = vrot.lane.b32.xlu1 %v239_v46, %s649_s22  ;;  %v362_v50 = vpop.permute.xlu0 %361  ;;  %v341_v53 = vadd.f32 %v340_v19, %v339_v49  ;;  %v466_v46 = vunpack.c.l.s4 %v651_v45 }
  0xf1   :  { %v326_v51 = vand.u32 2147483647, %v318_v48  ;;  %v431_v52 = vmul.f32 %v423_v32, %v383_v44  ;;  %v384_v3 = vsub.f32 %v735_v7, %v362_v50 }
  0xf2   :  { %v364_v54 = vpop.permute.xlu1 %363  ;;  %v467_v50 = vunpack.c.0.s8 %v466_v46 }
  0xf3   :  { %v342_v55 = vsel %vm328_vm4, %v326_v51, 0.0  ;;  %v439_v59 = vand.u32 2147483647, %v431_v52  ;;  %v385_v63 = vsub.f32 %v743_v11, %v364_v54 }
  0xf4   :  { %v343_v56 = vadd.f32 %v342_v55, %v341_v53  ;;  %v402_v57 = vpop.permute.xlu0 %401 }
  0xf5   :  { %v424_v58 = vmul.f32 %v402_v57, %v731_v6  ;;  %v449_v8 = vsel %vm448_vm6, %v439_v59, 0.0 }
  0xf6   :  { %345 = vrot.lane.b32.xlu0 %v343_v56, %s650_s23  ;;  %v366_v0 = vpop.permute.xlu1 %365 }
  0xf7   :  { %v432_v25 = vmul.f32 %v424_v58, %v384_v3  ;;  %v386_v6 = vsub.f32 %v759_v16, %v366_v0 }
  0xf8   :  { %v404_v1 = vpop.permute.xlu0 %403 }
  0xf9   :  { %v440_v5 = vand.u32 2147483647, %v432_v25  ;;  %v425_v61 = vmul.f32 %v404_v1, %v739_v10 }
  0xfa   :  { %v368_v62 = vpop.permute.xlu1 %367 }
  0xfb   :  { %v450_v7 = vsel %vm448_vm6, %v440_v5, 0.0  ;;  %v433_v12 = vmul.f32 %v425_v61, %v385_v63  ;;  %v387_v20 = vsub.f32 %v772_v22, %v368_v62 }
  0xfc   :  { %v451_v13 = vadd.f32 %v450_v7, %v449_v8  ;;  %v406_v17 = vpop.permute.xlu0 %405 }
  0xfd   :  { %v441_v60 = vand.u32 2147483647, %v433_v12  ;;  %v426_v18 = vmul.f32 %v406_v17, %v755_v15 }
  0xfe   :  { %v370_v2 = vpop.permute.xlu1 %369 }
  0xff   :  { %v452_v11 = vsel %vm448_vm6, %v441_v60, 0.0  ;;  %v434_v4 = vmul.f32 %v426_v18, %v386_v6  ;;  %v388_v37 = vsub.f32 %v781_v27, %v370_v2 }
 0x100   :  { %v453_v23 = vadd.f32 %v452_v11, %v451_v13  ;;  %v408_v24 = vpop.permute.xlu0 %407 }
 0x101   :  { %v442_v10 = vand.u32 2147483647, %v434_v4  ;;  %v427_v26 = vmul.f32 %v408_v24, %v768_v21 }
 0x102   :  { %v372_v28 = vpop.permute.xlu1 %371 }
 0x103   :  { %v454_v33 = vsel %vm448_vm6, %v442_v10, 0.0  ;;  %v435_v16 = vmul.f32 %v427_v26, %v387_v20  ;;  %v389_v22 = vsub.f32 %v792_v31, %v372_v28  ;;  %v469_v31 = vshrl.u32 %v194_v14, 7  ;;  %v327_v14 = vld [vmem:[#allocation3] sm:$0x3] }
 0x104   :  { %v455_v38 = vadd.f32 %v454_v33, %v453_v23  ;;  %v410_v39 = vpop.permute.xlu0 %409 }
 0x105   :  { %v443_v15 = vand.u32 2147483647, %v435_v16  ;;  %v428_v40 = vmul.f32 %v410_v39, %v788_v30  ;;  %v470_v54 = vsub.s32 %v467_v50, %v469_v31 }
 0x106   :  { %v374_v43 = vpop.permute.xlu1 %373 }
 0x107   :  { %v456_v9 = vsel %vm448_vm6, %v443_v15, 0.0  ;;  %v436_v29 = vmul.f32 %v428_v40, %v388_v37  ;;  %v390_v19 = vsub.f32 %v804_v35, %v374_v43  ;;  %v447_v35 = vld [vmem:[#allocation4] sm:$0x1] }
 0x108   :  { %v457_v41 = vadd.f32 %v456_v9, %v455_v38  ;;  %v412_v42 = vpop.permute.xlu0 %411 }
 0x109   :  { %v444_v21 = vand.u32 2147483647, %v436_v29  ;;  %v429_v44 = vmul.f32 %v412_v42, %v800_v34 }
 0x10b   :  { %v458_v27 = vsel %vm448_vm6, %v444_v21, 0.0  ;;  %v437_v47 = vmul.f32 %v429_v44, %v389_v22 }
 0x10c   :  { %v459_v48 = vadd.f32 %v458_v27, %v457_v41  ;;  %v414_v30 = vpop.permute.xlu0 %413 }
 0x10d   :  { %v445_v32 = vand.u32 2147483647, %v437_v47  ;;  %v430_v49 = vmul.f32 %v414_v30, %v812_v36  ;;  %v223_v36 = vld [vmem:[#allocation2] sm:$0x3] }
 0x10f   :  { %v460_v51 = vsel %vm448_vm6, %v445_v32, 0.0  ;;  %v438_v52 = vmul.f32 %v430_v49, %v390_v19 }
 0x110   :  { %v461_v53 = vadd.f32 %v460_v51, %v459_v48 }
 0x111   :  { %v446_v34 = vand.u32 2147483647, %v438_v52 }
 0x113   :  { %v462_v55 = vsel %vm448_vm6, %v446_v34, 0.0 }
 0x114   :  { %v463_v3 = vadd.f32 %v462_v55, %v461_v53 }
 0x116   :  { %v471_v56 = vrot.slane %v463_v3, %v470_v54 }
 0x118   :  { %v472_v57 = vcombine.high %v471_v56, %v471_v56 }
 0x11a   :  { %v479_v58 = vrot.slane %v472_v57, %v470_v54 }
 0x11c   :  { %v481_v59 = vadd.f32 %v479_v58, %v447_v35 }
 0x11e   :  { %483 = vst.msk [vmem:[#allocation4] sm:$0x1] %vm64_vm2, %v481_v59 }
 0x125   :  { %v511_v7 = vld [vmem:[#allocation4] sm:$0x1] }
 0x126   :  { %v512_v12 = vsel %vm64_vm2, %v511_v7, 0.0 }
 0x162   :  { %v242_v0 = vpop.permute.xlu1 %241 }
 0x163   :  { %v244_v25 = vadd.f32 %v242_v0, %v223_v36 }
 0x165   :  { %246 = vst.msk [vmem:[#allocation2] sm:$0x3] %vm60_vm1, %v244_v25 }
 0x168   :  { %v346_v63 = vpop.permute.xlu0 %345 }
 0x169   :  { %v348_v1 = vadd.f32 %v346_v63, %v327_v14 }
 0x16b   :  { %350 = vst.msk [vmem:[#allocation3] sm:$0x3] %vm62_vm5, %v348_v1 }
 0x16c   :  { %v487_v5 = vld [vmem:[#allocation2] sm:$0x3] }
 0x16d   :  { %v488_v8 = vsel %vm60_vm1, %v487_v5, 0.0 }
 0x16e   :  { %489 = vadd.xlane.f32.xlu1 %v488_v8 }
 0x172   :  { %v500_v61 = vld [vmem:[#allocation3] sm:$0x3] }
 0x173   :  { %v501_v62 = vsel %vm62_vm5, %v500_v61, 0.0 }
 0x174   :  { %502 = vadd.xlane.f32.xlu0 %v501_v62 }
 0x178   :  { %513 = vadd.xlane.f32.xlu0 %v512_v12 }
 0x1fb   :  { %v490_v6 = vpop.xlane.xlu1 %489 }
 0x1fc   :  { %v491_v13 = vrot.slane %v490_v6, 4 }
 0x1fe   :  { %v492_v17 = vadd.f32 %v491_v13, %v490_v6 }
 0x200   :  { %v493_v60 = vrot.slane %v492_v17, 2 }
 0x201   :  { %v503_v18 = vpop.xlane.xlu0 %502 }
 0x202   :  { %v504_v2 = vrot.slane %v503_v18, 4  ;;  %v494_v11 = vadd.f32 %v493_v60, %v492_v17 }
 0x204   :  { %v505_v4 = vadd.f32 %v504_v2, %v503_v18  ;;  %v495_v20 = vrot.slane %v494_v11, 1 }
 0x205   :  { %v514_v23 = vpop.xlane.xlu0 %513 }
 0x206   :  { %v506_v24 = vrot.slane %v505_v4, 2  ;;  %v515_v10 = vrot.slane %v514_v23, 4  ;;  %v496_v26 = vadd.f32 %v495_v20, %v494_v11 }
 0x208   :  { %v516_v28 = vadd.f32 %v515_v10, %v514_v23  ;;  %541 = vpush %v496_v26  ;;  %v507_v33 = vadd.f32 %v506_v24, %v505_v4 }
 0x20a   :  { %v517_v16 = vrot.slane %v516_v28, 2  ;;  %v508_v37 = vrot.slane %v507_v33, 1 }
 0x20c   :  { %v518_v38 = vadd.f32 %v517_v16, %v516_v28  ;;  %v509_v39 = vadd.f32 %v508_v37, %v507_v33 }
 0x20e   :  { %543 = vpush %v509_v39  ;;  %v519_v15 = vrot.slane %v518_v38, 1 }
 0x210   :  { %v520_v40 = vadd.f32 %v519_v15, %v518_v38 }
 0x212   :  { %545 = vpush %v520_v40 }
 0x239   :  { %s542_s24 = spop %541 }
 0x23a   :  { %499 = sst [smem:[#allocation11]] %s542_s24 }
 0x23f   :  { %s544_s25 = spop %543 }
 0x243   :  { %s546_s26 = spop %545 }
 0x244   :  { %s522_s27 = sadd.f32 %s546_s26, %s544_s25 }
 0x246   :  { %524 = sst [smem:[#allocation11 + $0x1]] %s522_s27 }
 0x247   :  { %634 = shalt.err (!%p631_p12)
}
 0x248   :  { %s652_s8 = smov [#allocation11]  }
 0x249   :  { %532 = dma.smem_to_hbm %s652_s8, 16, %s972_s3, [#allocation7]  }
 0x24a   :  { %639 = dma.done.wait [#allocation7], 16  }
 0x24b   :  { %640 = vsyncadd [#allocation7], 4294967280 }
 0x24c   :  { %536 = sfence }
 0x24d   :  { %537 = vsyncpa [#allocation6], 1 }
 0x24e   :  { %538 = vsyncpa [#allocation9], 1 }
 0x24f   :  { %539 = vsyncpa [#allocation7], 1 }

</bundles_post_ra>
